<compile_context>
chip_gen: v5e
topology: v5e:2x2
jax: 0.10.0
libtpu: 0.0.40
codegen_flags: <defaults>
</compile_context>

<pallas_src>
import functools

import numpy as np
import jax
import jax.numpy as jnp
from jax.experimental import pallas as pl
from jax.experimental.pallas import tpu as pltpu


def _round_up(x, m):
    return ((x + m - 1) // m) * m


@functools.lru_cache(maxsize=16)
def _dft_basis_np(n_eff, n_pad, T):
    """Stacked [cos; sin] DFT basis, rows >= n_eff zeroed, f32 numpy."""
    k = np.arange(n_pad, dtype=np.int64)[:, None]
    t = np.arange(T, dtype=np.int64)[None, :]
    # Reduce (k*t) mod T before the trig so the angle stays small and accurate
    # even when N*T is large (k*t can reach 1e6+).
    ang = (-2.0 * np.pi / T) * ((k * t) % T).astype(np.float64)
    valid = (k < n_eff).astype(np.float64)
    basis = np.concatenate([np.cos(ang) * valid, np.sin(ang) * valid], axis=0)
    return basis.astype(np.float32)                      # (2*n_pad, T)


def _make_kernel(n_pad, n_ct):
    def spectre_kernel(basis_ref, pred_ref, targ_ref, out_ref, acc_ref):
        j = pl.program_id(1)

        @pl.when(j == 0)
        def _():
            acc_ref[...] = jnp.zeros_like(acc_ref)

        basis = basis_ref[...]                            # (2*n_pad, T) bf16
        # Cast to bf16 in-kernel: MXU-native matmul speed, HBM traffic stays
        # the original f32 stream (no extra wrapper-side cast copy).
        p = pred_ref[...].astype(jnp.bfloat16)            # (T, ct)
        t = targ_ref[...].astype(jnp.bfloat16)            # (T, ct)

        # One wide MXU matmul per operand -> real & imaginary spectrum rows.
        ps = jnp.dot(basis, p, preferred_element_type=jnp.float32)  # (2*n_pad, ct)
        ts = jnp.dot(basis, t, preferred_element_type=jnp.float32)

        p_re, p_im = ps[:n_pad], ps[n_pad:]
        t_re, t_im = ts[:n_pad], ts[n_pad:]

        d = (jnp.sqrt(p_re * p_re + p_im * p_im)
             - jnp.sqrt(t_re * t_re + t_im * t_im))
        acc_ref[...] += d * d                             # elementwise accumulate

        @pl.when(j == n_ct - 1)
        def _():
            partial = jnp.sum(acc_ref[...])               # one final XLU reduce
            out_ref[...] = jnp.broadcast_to(
                partial, out_ref.shape).astype(jnp.float32)

    return spectre_kernel


def spectre_loss(pred, target, N=128):
    """Pallas implementation of SpectreLoss.forward. pred/target: (B, T, C)."""
    pred = pred.astype(jnp.float32)
    target = target.astype(jnp.float32)
    B, T, C = pred.shape
    n_eff = min(N, T)                  # torch slicing [:, :N, :] clamps to T
    n_pad = _round_up(n_eff, 8)        # sublane-aligned row count

    basis = jnp.asarray(_dft_basis_np(n_eff, n_pad, T), dtype=jnp.bfloat16)

    # ---- choose channel tile from a VMEM budget (v7x-safe: 64 MiB / TC) ----
    budget = 24 * 1024 * 1024
    basis_bytes = 2 * (2 * n_pad) * T * 2                 # double-buffered bf16

    def vmem_cost(ct):
        return (2 * 2 * T * ct * 4                        # pred/target, 2 bufs, f32
                + n_pad * ct * 4                          # accumulator scratch
                + basis_bytes)

    if vmem_cost(C) <= budget or C % 128 != 0:
        # Full channel extent in one block (always layout-legal since it equals
        # the array dim, even when C is not 128-aligned).
        # TODO(synk): huge non-128-aligned C could exceed the budget here; a
        # one-time pad of C to a 128 multiple would re-enable tiling.
        ct = C
    else:
        ct = 128
        for cand in range(1024, 127, -128):               # largest 128-multiple divisor
            if C % cand == 0 and vmem_cost(cand) <= budget:
                ct = cand
                break
    n_ct = max(C // ct, 1)

    needed = vmem_cost(ct)
    vmem_limit = int(min(max(needed * 3 // 2, 32 * 1024 * 1024),
                         100 * 1024 * 1024))

    cost = pl.CostEstimate(
        flops=2 * 2 * (2 * n_pad) * T * B * C,            # two matmuls per tile
        transcendentals=2 * n_pad * B * C,                # sqrt per spectrum bin
        bytes_accessed=2 * B * T * C * 4 + 2 * n_pad * T * 2 + B * 8 * 128 * 4,
    )

    out = pl.pallas_call(
        _make_kernel(n_pad, n_ct),
        out_shape=jax.ShapeDtypeStruct((B, 8, 128), jnp.float32),
        grid_spec=pltpu.PrefetchScalarGridSpec(
            num_scalar_prefetch=0,
            grid=(B, n_ct),
            in_specs=[
                # constant index_map -> basis fetched once across the whole grid
                pl.BlockSpec((2 * n_pad, T), lambda b, j: (0, 0)),
                # natural (B, T, C) layout, batch dim squeezed -> no transpose copy
                pl.BlockSpec((None, T, ct), lambda b, j: (b, 0, j)),
                pl.BlockSpec((None, T, ct), lambda b, j: (b, 0, j)),
            ],
            out_specs=pl.BlockSpec((None, 8, 128), lambda b, j: (b, 0, 0)),
            scratch_shapes=[pltpu.VMEM((n_pad, ct), jnp.float32)],
        ),
        compiler_params=pltpu.CompilerParams(
            # TODO(synk): on v7x, CORE_PARALLEL on the batch axis would guarantee
            # cross-TensorCore sharding; plain "parallel" is correct everywhere.
            dimension_semantics=("parallel", "arbitrary"),
            vmem_limit_bytes=vmem_limit,
        ),
        cost_estimate=cost,
    )(basis, pred, target)

    # One (8,128) slab of replicated per-batch partial sums.
    partials = out[:, 0, 0]
    return jnp.sum(partials) / float(B * n_eff * C)


def spectre_loss_ref(pred, target, N=128):
    ps = jnp.abs(jnp.fft.fft(pred, axis=1)[:, :N, :])
    ts = jnp.abs(jnp.fft.fft(target, axis=1)[:, :N, :])
    return jnp.mean((ps - ts) ** 2)


if __name__ == "__main__":
    key = jax.random.PRNGKey(0)
    k1, k2 = jax.random.split(key)
    B, T, C = 2, 16, 32
    N = 8
    pred = jax.random.normal(k1, (B, T, C), dtype=jnp.float32)
    target = jax.random.normal(k2, (B, T, C), dtype=jnp.float32)

    out = jax.block_until_ready(spectre_loss(pred, target, N=N))
    ref = jax.block_until_ready(spectre_loss_ref(pred, target, N=N))

    # bf16 MXU path: expect ~1e-2 level agreement with the f32 FFT reference.
    assert np.allclose(np.asarray(out), np.asarray(ref), rtol=2e-2, atol=2e-2), (
        out, ref)
    print("KERNEL_OK")
</pallas_src>

<mosaic_0001>
module attributes {stable_mosaic.version = 11 : i64} {
  func.func @spectre_kernel(%arg0: i32, %arg1: i32, %arg2: memref<16x16xbf16, #tpu.memory_space<vmem>>, %arg3: memref<1x16x32xf32, #tpu.memory_space<vmem>>, %arg4: memref<1x16x32xf32, #tpu.memory_space<vmem>>, %arg5: memref<1x8x128xf32, #tpu.memory_space<vmem>>, %arg6: memref<8x32xf32, #tpu.memory_space<vmem>>) attributes {dimension_semantics = [#tpu.dimension_semantics<parallel>, #tpu.dimension_semantics<arbitrary>], iteration_bounds = array<i64: 2, 1>, scalar_prefetch = 0 : i64, scratch_operands = 1 : i64, tpu.core_type = #tpu.core_type<tc>, window_params = [{pipeline_mode = #tpu.pipeline_mode<synchronous>, transform_indices = @transform_0, window_bounds = array<i64: 16, 16>}, {transform_indices = @transform_1, window_bounds = array<i64: 1, 16, 32>}, {transform_indices = @transform_2, window_bounds = array<i64: 1, 16, 32>}, {transform_indices = @transform_3, window_bounds = array<i64: 1, 8, 128>}]} {
    %c0_i32 = arith.constant 0 : i32
    %0 = arith.cmpi eq, %arg1, %c0_i32 : i32
    %1 = arith.extui %0 : i1 to i32
    %c0_i32_0 = arith.constant 0 : i32
    %2 = arith.cmpi ne, %1, %c0_i32_0 : i32
    scf.if %2 {
      %cst_15 = arith.constant 0.000000e+00 : f32
      %32 = vector.broadcast %cst_15 : f32 to vector<8x32xf32>
      %c0_16 = arith.constant 0 : index
      %c0_17 = arith.constant 0 : index
      %33 = vector.load %arg6[%c0_16, %c0_17] : memref<8x32xf32, #tpu.memory_space<vmem>>, vector<8x32xf32>
      tpu.vector_store %arg6[%c0_16, %c0_17], %32 {strides = array<i32>} : memref<8x32xf32, #tpu.memory_space<vmem>>, vector<8x32xf32>,
    } else {
    }
    %c0 = arith.constant 0 : index
    %c0_1 = arith.constant 0 : index
    %3 = vector.load %arg2[%c0, %c0_1] : memref<16x16xbf16, #tpu.memory_space<vmem>>, vector<16x16xbf16>
    %c0_2 = arith.constant 0 : index
    %c0_3 = arith.constant 0 : index
    %c0_4 = arith.constant 0 : index
    %4 = vector.load %arg3[%c0_2, %c0_3, %c0_4] : memref<1x16x32xf32, #tpu.memory_space<vmem>>, vector<1x16x32xf32>
    %5 = vector.shape_cast %4 : vector<1x16x32xf32> to vector<16x32xf32>
    %6 = arith.truncf %5 : vector<16x32xf32> to vector<16x32xbf16>
    %c0_5 = arith.constant 0 : index
    %c0_6 = arith.constant 0 : index
    %c0_7 = arith.constant 0 : index
    %7 = vector.load %arg4[%c0_5, %c0_6, %c0_7] : memref<1x16x32xf32, #tpu.memory_space<vmem>>, vector<1x16x32xf32>
    %8 = vector.shape_cast %7 : vector<1x16x32xf32> to vector<16x32xf32>
    %9 = arith.truncf %8 : vector<16x32xf32> to vector<16x32xbf16>
    %cst = arith.constant dense<0.000000e+00> : vector<16x32xf32>
    %10 = tpu.matmul %3, %6, %cst {dimension_numbers = #tpu.dot_dimension_numbers<[1], [0], [0], [1], [0, 0, 1, 1], [], []>} : vector<16x16xbf16>, vector<16x32xbf16>, vector<16x32xf32> -> vector<16x32xf32>
    %cst_8 = arith.constant dense<0.000000e+00> : vector<16x32xf32>
    %11 = tpu.matmul %3, %9, %cst_8 {dimension_numbers = #tpu.dot_dimension_numbers<[1], [0], [0], [1], [0, 0, 1, 1], [], []>} : vector<16x16xbf16>, vector<16x32xbf16>, vector<16x32xf32> -> vector<16x32xf32>
    %12 = vector.extract_strided_slice %10 {offsets = [0, 0], sizes = [8, 32], strides = [1, 1]} : vector<16x32xf32> to vector<8x32xf32>
    %13 = vector.extract_strided_slice %10 {offsets = [8, 0], sizes = [8, 32], strides = [1, 1]} : vector<16x32xf32> to vector<8x32xf32>
    %14 = vector.extract_strided_slice %11 {offsets = [0, 0], sizes = [8, 32], strides = [1, 1]} : vector<16x32xf32> to vector<8x32xf32>
    %15 = vector.extract_strided_slice %11 {offsets = [8, 0], sizes = [8, 32], strides = [1, 1]} : vector<16x32xf32> to vector<8x32xf32>
    %16 = arith.mulf %12, %12 : vector<8x32xf32>
    %17 = arith.mulf %13, %13 : vector<8x32xf32>
    %18 = arith.addf %16, %17 : vector<8x32xf32>
    %19 = math.sqrt %18 : vector<8x32xf32>
    %20 = arith.mulf %14, %14 : vector<8x32xf32>
    %21 = arith.mulf %15, %15 : vector<8x32xf32>
    %22 = arith.addf %20, %21 : vector<8x32xf32>
    %23 = math.sqrt %22 : vector<8x32xf32>
    %24 = arith.subf %19, %23 : vector<8x32xf32>
    %c0_9 = arith.constant 0 : index
    %c0_10 = arith.constant 0 : index
    %25 = vector.load %arg6[%c0_9, %c0_10] : memref<8x32xf32, #tpu.memory_space<vmem>>, vector<8x32xf32>
    %26 = arith.mulf %24, %24 : vector<8x32xf32>
    %27 = arith.addf %25, %26 : vector<8x32xf32>
    %c0_11 = arith.constant 0 : index
    %c0_12 = arith.constant 0 : index
    %28 = vector.load %arg6[%c0_11, %c0_12] : memref<8x32xf32, #tpu.memory_space<vmem>>, vector<8x32xf32>
    tpu.vector_store %arg6[%c0_11, %c0_12], %27 {strides = array<i32>} : memref<8x32xf32, #tpu.memory_space<vmem>>, vector<8x32xf32>,
    %c0_i32_13 = arith.constant 0 : i32
    %29 = arith.cmpi eq, %arg1, %c0_i32_13 : i32
    %30 = arith.extui %29 : i1 to i32
    %c0_i32_14 = arith.constant 0 : i32
    %31 = arith.cmpi ne, %30, %c0_i32_14 : i32
    scf.if %31 {
      %c0_15 = arith.constant 0 : index
      %c0_16 = arith.constant 0 : index
      %32 = vector.load %arg6[%c0_15, %c0_16] : memref<8x32xf32, #tpu.memory_space<vmem>>, vector<8x32xf32>
      %33 = vector.shape_cast %32 : vector<8x32xf32> to vector<1x8x32xf32>
      %cst_17 = arith.constant dense<0.000000e+00> : vector<1xf32>
      %34 = vector.multi_reduction <add>, %33, %cst_17 [1, 2] : vector<1x8x32xf32> to vector<1xf32>
      %35 = vector.shape_cast %34 : vector<1xf32> to vector<1x1x1xf32>
      %36 = vector.extract %35[0, 0, 0] : f32 from vector<1x1x1xf32>
      %37 = vector.broadcast %36 : f32 to vector<8x128xf32>
      %c0_18 = arith.constant 0 : index
      %c0_19 = arith.constant 0 : index
      %c0_20 = arith.constant 0 : index
      %38 = vector.load %arg5[%c0_18, %c0_19, %c0_20] : memref<1x8x128xf32, #tpu.memory_space<vmem>>, vector<1x8x128xf32>
      %39 = vector.shape_cast %38 : vector<1x8x128xf32> to vector<8x128xf32>
      %40 = vector.shape_cast %37 : vector<8x128xf32> to vector<1x8x128xf32>
      tpu.vector_store %arg5[%c0_18, %c0_19, %c0_20], %40 {strides = array<i32>} : memref<1x8x128xf32, #tpu.memory_space<vmem>>, vector<1x8x128xf32>,
    } else {
    }
    return
  }
  func.func @transform_0(%arg0: i32, %arg1: i32) -> (i32, i32) {
    %c0_i32 = arith.constant 0 : i32
    %c0_i32_0 = arith.constant 0 : i32
    %c0_i32_1 = arith.constant 0 : i32
    return %c0_i32, %c0_i32_0 : i32, i32
  }
  func.func @transform_1(%arg0: i32, %arg1: i32) -> (i32, i32, i32) {
    %c0_i32 = arith.constant 0 : i32
    %c0_i32_0 = arith.constant 0 : i32
    return %arg0, %c0_i32, %arg1 : i32, i32, i32
  }
  func.func @transform_2(%arg0: i32, %arg1: i32) -> (i32, i32, i32) {
    %c0_i32 = arith.constant 0 : i32
    %c0_i32_0 = arith.constant 0 : i32
    return %arg0, %c0_i32, %arg1 : i32, i32, i32
  }
  func.func @transform_3(%arg0: i32, %arg1: i32) -> (i32, i32, i32) {
    %c0_i32 = arith.constant 0 : i32
    %c0_i32_0 = arith.constant 0 : i32
    %c0_i32_1 = arith.constant 0 : i32
    return %arg0, %c0_i32, %c0_i32_0 : i32, i32, i32
  }
}

</mosaic_0001>

<bundles_post_ra>
// kernel: tpu_custom_call.1
= control target key start
LH: loop header
LB: loop body
LE: loop exit
PB: predicated region body
PF: predicated region fallthrough
CT: control target
= control target key end

     0   :  { %8 = vsyncpa [#allocation4], 0  ;;  %s990_s0 = inlined_call_operand.hbm [shape: bf16[16,16], index: 0, kind: input, shape index: {}]   ;;  %s991_s1 = inlined_call_operand.hbm [shape: f32[2,16,32], index: 1, kind: input, shape index: {}]   ;;  %s992_s2 = inlined_call_operand.hbm [shape: f32[2,16,32], index: 2, kind: input, shape index: {}]   ;;  %s993_s3 = inlined_call_operand.hbm [shape: f32[2,8,128], index: 3, kind: output, shape index: {}]  }
   0x1   :  { %9 = vsyncpa [#allocation7], 0 }
   0x2   :  { %11 = vsyncpa [#allocation7 + $0x1], 0 }
   0x3   :  { %12 = vsyncpa [#allocation5], 0 }
   0x4   :  { %14 = vsyncpa [#allocation5 + $0x1], 0  ;;  %s821_s12 = smov 0   ;;  %s823_s13 = smov 0  }
   0x5   :  { %s825_s14 = smov 0   ;;  %s827_s15 = smov 0  }
   0x6   :  { %s829_s16 = smov 0   ;;  %s831_s17 = smov 0  }
   0x7 LB: > { %s32_s18 = sadd.s32 1, %s789_s16  ;;  %s62_s19 = sadd.s32 1, %s781_s14  ;;  %s793_s17 = sphi %s831_s17, %s20_s17   ;;  %s789_s16 = sphi %s829_s16, %s1003_s16   ;;  %s785_s15 = sphi %s827_s15, %s1002_s15   ;;  %s781_s14 = sphi %s825_s14, %s1001_s14   ;;  %s777_s13 = sphi %s823_s13, %s1000_s13   ;;  %s773_s12 = sphi %s821_s12, %s999_s12  }
   0x8   : > { %p34_p0 = scmp.ge.s32.totalorder %s32_s18, 2  ;;  %p69_p1 = scmp.ne.s32.totalorder %s781_s14, %s777_s13 }
   0x9   : > { %p70_p2 = scmp.eq.s32.totalorder %s793_s17, 0  ;;  %p503_p3 = scmp.ge.s32.totalorder %s793_s17, 2 }
   0xa   : > { %s1005_s18 = smov (%p34_p0, %s32_s18), 0  ;;  %p556_p5 = scmp.lt.s32.totalorder %s793_s17, 2 }
   0xb   : > { %p862_p4 = por %p70_p2, %p69_p1  ;;  %s57_s21 = ssub.s32 %s789_s16, %s1005_s18 }
   0xc   : > { %s167_s22 = sand.u32 1, %s793_s17   ;;  %p60_p6 = scmp.eq.s32.totalorder %s57_s21, 0 }
   0xd   : > { %s169_s23 = sand.u32 1, %s781_s14   ;;  %s525_s24 = sshll.u32 %s789_s16, 4 }
   0xe   : > { %s873_s25 = scalar_select %p60_p6, %s781_s14, %s62_s19  }
   0xf   : > { %s504_s26 = sshll.u32 %s169_s23, 4  ;;  %s177_s29 = scalar_lea.hbm %s991_s1, %s525_s24 }
  0x10   : > { %s178_s30 = sshll.u32 %s177_s29, 4  ;;  %s171_s4 = scalar_lea.vmem [#allocation6], %s504_s26  ;;  %s179_s30 = int_to_ptr.hbm [resolvable:$true] %s178_s30 }
  0x11   : > { %s180_s5 = sshll.u32 %s171_s4, 4  ;;  %p882_p7 = pnand %p556_p5, %p862_p4  ;;  %s181_s5 = int_to_ptr.vmem [resolvable:$true] %s180_s5 }
  0x12   : > { %s886_s7 = scalar_lea.sflag [#allocation7], %s167_s22  ;;  %s795_s8 = smov 128  }
  0x13   : > { %s796_s9 = smov 8   ;;  %s200_s19 = scalar_lea.hbm %s992_s2, %s525_s24 }
  0x14   : > { %547 = dma.hbm_to_vmem [thread:$0]  (!%p882_p7), %s179_s30, 256, %s181_s5, %s886_s7, %s795_s8, %s795_s8, %s796_s9  }
  0x15   : > { %s194_s20 = scalar_lea.vmem [#allocation8], %s504_s26  ;;  %s201_s23 = sshll.u32 %s200_s19, 4  ;;  %s202_s23 = int_to_ptr.hbm [resolvable:$true] %s201_s23 }
  0x16   : > { %s203_s21 = sshll.u32 %s194_s20, 4  ;;  %s898_s22 = sadd.s32 4294967295, %s793_s17   ;;  %s204_s21 = int_to_ptr.vmem [resolvable:$true] %s203_s21 }
  0x17   : > { %s500_s27 = sadd.s32 4294967294, %s793_s17   ;;  %p75_p8 = scmp.ne.s32.totalorder %s777_s13, %s773_s12 }
  0x18   : > { %p76_p9 = scmp.eq.s32.totalorder %s898_s22, 0  ;;  %p127_p10 = scmp.eq.s32.totalorder %s898_s22, 1 }
  0x19   : > { %p133_p11 = scmp.eq.s32.totalorder %s500_s27, 1  ;;  %p501_p12 = scmp.ge.s32.totalorder %s793_s17, 1 }
  0x1a   : > { %p908_p13 = por %p76_p9, %p75_p8  ;;  %p915_p0 = por %p127_p10, %p69_p1 }
  0x1b   : > { %p919_p2 = por %p133_p11, %p75_p8  ;;  %p140_p4 = scmp.lt.s32.totalorder %s793_s17, 3 }
  0x1c   : > { %s151_s4 = sshll.u32 %s990_s0, 4  ;;  %s797_s5 = smov [#allocation3]   ;;  %s152_s4 = int_to_ptr.hbm [resolvable:$true] %s151_s4 }
  0x1d   : > { %p141_p5 = pnand %p501_p12, %p140_p4  ;;  %s153_s10 = sshll.u32 %s797_s5, 4  ;;  %s154_s10 = int_to_ptr.vmem [resolvable:$true] %s153_s10 }
  0x1e   : > { %550 = dma.hbm_to_vmem [thread:$0]  (!%p882_p7), %s202_s23, 256, %s204_s21, %s886_s7, %s795_s8, %s795_s8, %s796_s9  }
  0x1f   : > { %p540_p6 = pneg %p141_p5  ;;  %s798_s11 = smov 64  }
  0x20   : > { %s799_s19 = smov 4   ;;  %215 = sbr.rel (%p141_p5) target bundleno = 405 (0x195), region = 32 }
  0x21   : > { %p541_p1 = pnand %p540_p6, %p76_p9 }
  0x23   : > { %543 = dma.hbm_to_vmem [thread:$0]  (!%p541_p1), %s152_s4, 128, %s154_s10, [#allocation4], %s798_s11, %s798_s11, %s799_s19  }
  0x25   : > { %760 = dma.done.wait (%p76_p9), [#allocation4], 128  }
  0x26   : > { %762 = vsyncadd (%p76_p9), [#allocation4], 4294967168  ;;  %s222_s20 = sand.u32 1, %s898_s22   ;;  %s941_s27 = sand.u32 1, %s777_s13  }
  0x27   : > { %s512_s6 = sshll.u32 %s941_s27, 4  ;;  %s223_s29 = scalar_lea.sflag [#allocation7], %s222_s20 }
  0x28   : > { %s226_s7 = scalar_lea.vmem [#allocation6], %s512_s6 }
  0x29   : > { %764 = dma.done.wait (%p908_p13), %s223_s29, 512  }
  0x2a   : > { %766 = vsyncadd (%p908_p13), %s223_s29, 4294966784  ;;  %v274_v0 = vld [vmem:[%s226_s7] sm:$0xff]  ;;  %v275_v1 = vld [vmem:[%s226_s7 + $0x8] sm:$0xff]  ;;  %s236_s8 = scalar_lea.vmem [#allocation8], %s512_s6  ;;  %vm285_vm0 = vcmask 130048   ;;  %vm270_vm1 = vcmask 261120  }
  0x2b   : > { %v277_v2 = vld [vmem:[%s236_s8] sm:$0xff]  ;;  %v276_v3 = vpack.c.bf16 %v275_v1, %v274_v0  ;;  %v278_v4 = vld [vmem:[%s236_s8 + $0x8] sm:$0xff]  ;;  %v800_v7 = vmov 0.0   ;;  %s514_s9 = sshll.u32 %s941_s27, 3  ;;  %s522_s21 = sshll.u32 %s785_s15, 3 }
  0x2c   : > { %v279_v5 = vpack.c.bf16 %v278_v4, %v277_v2  ;;  %v527_v6 = vld [vmem:[#allocation3] sm:$0xff]  ;;  %271 = vst.msk [vmem:[#allocation2] sm:$0xff] %vm270_vm1, %v800_v7  ;;  %s380_s24 = scalar_lea.hbm %s993_s3, %s522_s21  ;;  %s264_s30 = scalar_lea.vmem [#allocation9], %s514_s9 }
  0x2d   : > { %296 = vmatpush.bf16.msra.mxu0 %v276_v3  ;;  %s382_s4 = sshll.u32 %s264_s30, 4  ;;  %s384_s5 = sshll.u32 %s380_s24, 4  ;;  %s383_s4 = int_to_ptr.vmem [resolvable:$true] %s382_s4  ;;  %s385_s5 = int_to_ptr.hbm [resolvable:$true] %s384_s5 }
  0x2e   : > { %310 = vmatpush.bf16.msra.mxu1 %v279_v5  ;;  %s370_s11 = scalar_lea.sflag [#allocation5], %s941_s27  ;;  %s721_s19 = sshra.s32 %s385_s5, 4  ;;  %s722_s19 = int_to_ptr.hbm [resolvable:$true] %s721_s19 }
  0x2f   : > { %s723_s20 = scalar_lea.hbm %s722_s19, 8  ;;  %s727_s29 = scalar_lea.hbm %s993_s3, 16 }
  0x30   : > { %519 = vmatmul.msk.bf16.vlgmr.msra.gmra.mxu0 %vm285_vm0, %v527_v6  ;;  %p724_p7 = scmp.ne.s32.totalorder %s722_s19, %s723_s20  ;;  %p728_p10 = scmp.lt.s32.totalorder %s722_s19, %s993_s3 }
  0x31   : > { %520 = vmatmul.msk.bf16.vlgmr.msra.gmra.mxu1 %vm285_vm0, %v527_v6  ;;  %p729_p11 = scmp.lt.s32.totalorder %s727_s29, %s723_s20 }
  0x32   : > { %p725_p8 = pnand %p724_p7, %p915_p0 }
  0x33   : > { %v348_v39 = vld [vmem:[#allocation2] sm:$0xff]  ;;  %p730_p12 = por %p729_p11, %p728_p10 }
  0x34   : > { %p726_p9 = pneg %p725_p8 }
  0x36   : > { %p731_p13 = pnand %p730_p12, %p726_p9 }
  0xad   : > { %v298_v8 = vpop.f32.mrf.mxu0 }
  0xae   : > { %v312_v9 = vpop.f32.mrf.mxu1  ;;  %v317_v11 = vmul.f32 %v298_v8, %v298_v8 }
  0xaf   : > { %v332_v14 = vmul.f32 %v312_v9, %v312_v9 }
  0xb5   : > { %v300_v10 = vpop.f32.mrf.mxu0 }
  0xb6   : > { %v318_v12 = vmul.f32 %v300_v10, %v300_v10  ;;  %v314_v13 = vpop.f32.mrf.mxu1 }
  0xb7   : > { %v333_v15 = vmul.f32 %v314_v13, %v314_v13 }
  0xb8   : > { %v319_v16 = vadd.f32 %v318_v12, %v317_v11 }
  0xb9   : > { %v334_v17 = vadd.f32 %v333_v15, %v332_v14 }
  0xba   : > { %613 = vrsqrt.f32 %v319_v16  ;;  %vm327_vm2 = vcmp.eq.f32.partialorder %v319_v16, inf  ;;  %v330_v31 = vand.u32 2147483648, %v319_v16  ;;  %vm329_vm3 = vcmp.eq.f32.partialorder %v319_v16, 0.0 }
  0xbb   : > { %615 = vrsqrt.f32 %v334_v17  ;;  %vm342_vm4 = vcmp.eq.f32.partialorder %v334_v17, inf  ;;  %v345_v34 = vand.u32 2147483648, %v334_v17  ;;  %vm344_vm5 = vcmp.eq.f32.partialorder %v334_v17, 0.0 }
  0xc0   : > { %v614_v18 = vpop.eup %613 }
  0xc1   : > { %v616_v19 = vpop.eup %615  ;;  %v321_v20 = vmul.f32 %v614_v18, %v319_v16 }
  0xc2   : > { %v336_v21 = vmul.f32 %v616_v19, %v334_v17 }
  0xc3   : > { %v322_v22 = vmul.f32 %v614_v18, %v321_v20 }
  0xc4   : > { %v337_v23 = vmul.f32 %v616_v19, %v336_v21 }
  0xc5   : > { %v323_v24 = vmul.f32 0.5, %v322_v22 }
  0xc6   : > { %v338_v25 = vmul.f32 0.5, %v337_v23 }
  0xc7   : > { %v324_v26 = vsub.f32 1.5, %v323_v24 }
  0xc8   : > { %v339_v27 = vsub.f32 1.5, %v338_v25 }
  0xc9   : > { %v325_v28 = vmul.f32 %v614_v18, %v324_v26 }
  0xca   : > { %v340_v29 = vmul.f32 %v616_v19, %v339_v27 }
  0xcb   : > { %v326_v30 = vmul.f32 %v325_v28, %v319_v16 }
  0xcc   : > { %v341_v32 = vmul.f32 %v340_v29, %v334_v17 }
  0xcd   : > { %v328_v33 = vsel %vm327_vm2, %v319_v16, %v326_v30 }
  0xce   : > { %v331_v35 = vsel %vm329_vm3, %v330_v31, %v328_v33  ;;  %v343_v36 = vsel %vm342_vm4, %v334_v17, %v341_v32 }
  0xcf   : > { %v346_v37 = vsel %vm344_vm5, %v345_v34, %v343_v36 }
  0xd0   : > { %v347_v38 = vsub.f32 %v331_v35, %v346_v37 }
  0xd2   : > { %v349_v40 = vmul.f32 %v347_v38, %v347_v38 }
  0xd4   : > { %v350_v41 = vadd.f32 %v349_v40, %v348_v39 }
  0xd6   : > { %352 = vst.msk [vmem:[#allocation2] sm:$0xff] %vm270_vm1, %v350_v41 }
  0xdd   : > { %v356_v42 = vld [vmem:[#allocation2] sm:$0xff] }
  0xde   : > { %v357_v43 = vsel %vm270_vm1, %v356_v42, 0.0 }
  0xdf   : > { %358 = vadd.xlane.f32.xlu0 %v357_v43 }
 0x152   : > { %v359_v44 = vpop.xlane.xlu0 %358 }
 0x153   : > { %v360_v45 = vrot.slane %v359_v44, 4 }
 0x155   : > { %v361_v46 = vadd.f32 %v360_v45, %v359_v44 }
 0x157   : > { %v362_v47 = vrot.slane %v361_v46, 2 }
 0x159   : > { %v363_v48 = vadd.f32 %v362_v47, %v361_v46 }
 0x15b   : > { %v364_v49 = vrot.slane %v363_v48, 1 }
 0x15d   : > { %v365_v50 = vadd.f32 %v364_v49, %v363_v48 }
 0x15f   : > { %528 = vpush %v365_v50 }
 0x190   : > { %s529_s10 = spop %528 }
 0x191   : > { %v367_v51 = vstv %s529_s10 }
 0x192   : > { %368 = vst [vmem:[%s264_s30] sm:$0xff] %v367_v51 }
 0x193   : > { %734 = shalt.err (!%p731_p13)
}
 0x194   : > { %538 = dma.vmem_to_hbm [thread:$0]  (%p915_p0), %s383_s4, 128, %s385_s5, %s370_s11  }
 0x195 PF: > { %s396_s27 = sand.u32 1, %s773_s12   ;;  %p552_p4 = pnand %p503_p3, %p919_p2 }
 0x196   : > { %s397_s9 = scalar_lea.sflag [#allocation5], %s396_s27 }
 0x197   : > { %p553_p5 = pneg %p552_p4 }
 0x199   : > { %768 = dma.done.wait (%p553_p5), %s397_s9, 128  }
 0x19a   : > { %770 = vsyncadd (%p553_p5), %s397_s9, 4294967168  ;;  %s20_s17 = sadd.s32 1, %s793_s17   ;;  %s999_s12 = smov %s777_s13 }
 0x19b   : > { %p17_p6 = scmp.ge.s32.totalorder %s20_s17, 4   ;;  %s1000_s13 = smov %s781_s14 }
 0x19c   : > { %s1001_s14 = smov %s873_s25  ;;  %s1002_s15 = smov %s789_s16 }
 0x19d   : > { %s1003_s16 = smov %s1005_s18  ;;  %19 = sbr.rel (!%p17_p6) target bundleno = 7 (0x7), region = 101 }
 0x1a2   :  { %403 = vsyncpa [#allocation4], 1 }
 0x1a3   :  { %405 = vsyncpa [#allocation4 + $0x1], 1 }
 0x1a4   :  { %406 = vsyncpa [#allocation7], 1 }
 0x1a5   :  { %408 = vsyncpa [#allocation7 + $0x1], 1 }
 0x1a6   :  { %409 = vsyncpa [#allocation5], 1 }
 0x1a7   :  { %411 = vsyncpa [#allocation5 + $0x1], 1 }

</bundles_post_ra>
